<compile_context>
chip_gen: v5e
topology: v5e:2x2
jax: 0.10.0
libtpu: 0.0.40
codegen_flags: <defaults>
</compile_context>

<pallas_src>
import functools

import jax
import jax.numpy as jnp
import numpy as np
from jax.experimental import pallas as pl
from jax.experimental.pallas import tpu as pltpu


def _rank_loss_kernel(scores_ref, targets_ref, table_ref, out_ref, *,
                      margin, n_rows, block_rows):
    """Write sum_n weight(rank_n) * hinge_n for this row tile into out_ref.

    scores_ref : (tm, C) native dtype
    targets_ref: (tm, 1) int32
    table_ref  : (1, C)  f32, table[k] = H_k / k  (table[0] = 0)
    out_ref    : (1, 1, 1) f32, this tile's partial sum
    """
    i = pl.program_id(0)

    s = scores_ref[...].astype(jnp.float32)                  # (tm, C)
    t = targets_ref[...]                                     # (tm, 1) int32
    tm, C = s.shape

    col = jax.lax.broadcasted_iota(jnp.int32, (tm, C), 1)    # class index

    # gather(scores, 1, targets): one-hot masked lane reduce (XLU), kept off
    # the MXU on purpose — it feeds everything below.
    gt_score = jnp.sum(jnp.where(col == t, s, 0.0), axis=-1, keepdims=True)

    # hinge: sum_{y != gt} relu(margin + s_y - s_gt)
    # Computed over ALL classes (2 VALU ops / element); the gt column
    # contributes exactly relu(margin), a compile-time constant, subtracted
    # per row afterwards (relu, not raw margin, so margin <= 0 stays correct).
    thr = gt_score - jnp.float32(margin)                     # (tm, 1)
    l = jnp.maximum(s - thr, 0.0)                            # (tm, C)
    hinge = (jnp.sum(l, axis=-1, keepdims=True)
             - jnp.float32(max(float(margin), 0.0)))         # (tm, 1)

    # rank of gt in a descending sort == #{y : s_y > s_gt}.  MXU matvec of an
    # exact 0/1 indicator with a ones RHS: exact in f32 regardless of the
    # MXU's internal f32 handling, and it frees a VPU/XLU lane reduction.
    ind = (s > gt_score).astype(jnp.float32)                 # (tm, C)
    ones_c = jnp.ones((C, 1), jnp.float32)
    rank = jnp.dot(ind, ones_c, preferred_element_type=jnp.float32)  # (tm, 1)
    rank_i = rank.astype(jnp.int32)                          # exact small ints

    # weight = nan_to_num(H_rank / rank) via one-hot lookup into the table.
    # Kept as select + lane reduce (VPU/XLU) to preserve f32 table precision.
    weight = jnp.sum(jnp.where(col == rank_i, table_ref[...], 0.0),
                     axis=-1, keepdims=True)                 # (tm, 1)

    per_row = weight * hinge                                 # (tm, 1)

    # Mask rows past N in the (possibly partial) last tile.  where-select, so
    # NaN/garbage from padded rows cannot leak into the partial sum.
    row = i * block_rows + jax.lax.broadcasted_iota(jnp.int32, (tm, 1), 0)
    per_row = jnp.where(row < n_rows, per_row, 0.0)

    out_ref[...] = jnp.sum(per_row, axis=0, keepdims=True).reshape(1, 1, 1)


def _harmonic_table(n_classes):
    """T[k] = H_k / k with T[0] = 0, shape (1, C) f32."""
    k = np.arange(n_classes, dtype=np.float64)
    recip = np.where(k > 0, 1.0 / np.maximum(k, 1.0), 0.0)
    harm = np.cumsum(recip)                                   # H_k (H_0 = 0)
    tbl = np.where(k > 0, harm / np.maximum(k, 1.0), 0.0)
    return jnp.asarray(tbl, dtype=jnp.float32).reshape(1, n_classes)


def _tpu_vmem_capacity_bytes():
    """Physical VMEM per core; conservative 64 MiB (v7x) if unknown."""
    try:
        cap = getattr(pltpu.get_tpu_info(), "vmem_capacity_bytes", None)
        if cap:
            return int(cap)
    except Exception:
        pass
    return 64 << 20


def _lane_pad(c):
    return ((c + 127) // 128) * 128


def _pick_block_rows(n_rows, n_cols, itemsize, vmem_cap):
    """Row tile from a generation-aware VMEM budget with full accounting:
    double-buffered scores + lane-padded targets tiles + in-kernel (tm, Cpad)
    f32/i32 temporaries."""
    cpad = _lane_pad(n_cols)
    per_row = (2 * n_cols * itemsize          # scores, double-buffered
               + 2 * 128 * 4                  # targets, lane-padded, double-buffered
               + 4 * cpad * 4)                # in-kernel f32/i32 temporaries
    if vmem_cap >= (100 << 20):               # v5e / v6e: 128 MiB, HBM-bound -> big tiles
        budget, cap_rows = 40 << 20, 1024
    else:                                     # v7x: 64 MiB physical
        budget, cap_rows = 16 << 20, 512
    tm = budget // max(per_row, 1)
    tm = max(8, (tm // 8) * 8)
    tm = min(tm, cap_rows)
    n_rounded = max(8, ((n_rows + 7) // 8) * 8)
    return min(tm, n_rounded)


def weighted_rank_pairwise_loss2(scores, targets, W=None,
                                 margin=1.0, reg_lambda=1.0, block_rows=None):
    """JAX/Pallas equivalent of WeightedRankPairwiseLoss2.forward."""
    N, C = scores.shape
    itemsize = jnp.dtype(scores.dtype).itemsize
    vmem_cap = _tpu_vmem_capacity_bytes()

    tm = (_pick_block_rows(N, C, itemsize, vmem_cap)
          if block_rows is None else block_rows)
    assert tm % 8 == 0, "block_rows must be a multiple of 8"
    n_tiles = pl.cdiv(N, tm)

    targets2d = targets.reshape(N, 1).astype(jnp.int32)
    table = _harmonic_table(C)                                # (1, C) f32

    # Full VMEM accounting: inputs (double-buffered), lane/sublane padding,
    # in-kernel temporaries, plus headroom for compiler scratch.
    cpad = _lane_pad(C)
    est_vmem = (2 * tm * C * itemsize          # scores tiles
                + 2 * tm * 128 * 4             # targets tiles (lane-padded)
                + 4 * tm * cpad * 4            # in-kernel (tm, Cpad) temporaries
                + 2 * 8 * cpad * 4             # harmonic table (sublane-padded)
                + (8 << 20))                   # headroom
    vmem_limit = int(min(max(32 << 20, est_vmem), vmem_cap))

    partials = pl.pallas_call(
        functools.partial(_rank_loss_kernel, margin=float(margin),
                          n_rows=N, block_rows=tm),
        out_shape=jax.ShapeDtypeStruct((n_tiles, 1, 1), jnp.float32),
        grid_spec=pltpu.PrefetchScalarGridSpec(
            num_scalar_prefetch=0,
            grid=(n_tiles,),
            in_specs=[pl.BlockSpec((tm, C), lambda i: (i, 0)),   # scores (native dtype)
                      pl.BlockSpec((tm, 1), lambda i: (i, 0)),   # targets
                      pl.BlockSpec((1, C), lambda i: (0, 0))],   # harmonic table (const)
            out_specs=pl.BlockSpec((1, 1, 1), lambda i: (i, 0, 0))),
        compiler_params=pltpu.CompilerParams(
            dimension_semantics=("parallel",),   # independent tiles -> megacore split on v7x
            vmem_limit_bytes=vmem_limit),
    )(scores, targets2d, table)

    # One XLA tree-reduce over the per-tile partials (better f32 accuracy than
    # a serial running accumulator), then the mean.
    loss = jnp.sum(partials) / jnp.float32(N)

    if W is not None:
        Ws = W if isinstance(W, (list, tuple)) else [W]
        param_norm = jnp.float32(0.0)
        for w in Ws:
            # plain XLA fused reduction; no Pallas kernel needed here
            param_norm = param_norm + jnp.sum(jnp.square(w.astype(jnp.float32)))
        loss = loss + reg_lambda * param_norm

    return loss


def _reference(scores, targets, W=None, margin=1.0, reg_lambda=1.0):
    """Pure-JAX reference mirroring the PyTorch forward."""
    scores = scores.astype(jnp.float32)
    N, C = scores.shape
    col = jnp.arange(C)[None, :]
    t = targets[:, None].astype(jnp.int32)
    mask = (col != t).astype(jnp.float32)
    gt = jnp.take_along_axis(scores, t, axis=1)
    l = (mask * margin + scores - gt) * mask
    l = jnp.where(l > 0.0, l, 0.0)
    hinge = l.sum(-1)
    rank = jnp.sum(scores > gt, axis=-1)
    harm = jnp.sum(
        jnp.where(col < rank[:, None], 1.0 / (col.astype(jnp.float32) + 1.0), 0.0),
        axis=-1)
    weight = jnp.where(rank > 0, harm / rank, 0.0)
    loss = jnp.mean(weight * hinge)
    if W is not None:
        Ws = W if isinstance(W, (list, tuple)) else [W]
        loss = loss + reg_lambda * sum(jnp.sum(w.astype(jnp.float32) ** 2) for w in Ws)
    return loss


if __name__ == "__main__":
    key = jax.random.PRNGKey(0)
    k1, k2, k3, k4, k5 = jax.random.split(key, 5)

    # --- test 1: small, with regularizer ------------------------------------
    N, C = 8, 16
    scores = jax.random.normal(k1, (N, C), dtype=jnp.float32)
    targets = jax.random.randint(k2, (N,), 0, C, dtype=jnp.int32)
    W = jax.random.normal(k3, (32, 16), dtype=jnp.float32) * 0.05

    out = weighted_rank_pairwise_loss2(scores, targets, W=W,
                                       margin=1.0, reg_lambda=1.0)
    out = jax.block_until_ready(out)
    ref = _reference(scores, targets, W=W, margin=1.0, reg_lambda=1.0)
    assert jnp.allclose(out, ref, rtol=1e-5, atol=1e-4), (out, ref)

    # --- test 2: C not a multiple of 128, N not a multiple of the row tile ---
    N2, C2 = 24, 130
    scores2 = jax.random.normal(k4, (N2, C2), dtype=jnp.float32)
    targets2 = jax.random.randint(k5, (N2,), 0, C2, dtype=jnp.int32)

    out2 = weighted_rank_pairwise_loss2(scores2, targets2, W=None,
                                        margin=1.0, reg_lambda=1.0,
                                        block_rows=16)   # forces a partial tile
    out2 = jax.block_until_ready(out2)
    ref2 = _reference(scores2, targets2, W=None, margin=1.0, reg_lambda=1.0)
    assert jnp.allclose(out2, ref2, rtol=1e-5, atol=1e-4), (out2, ref2)

    print("KERNEL_OK")
</pallas_src>

<mosaic_0001>
module attributes {stable_mosaic.version = 11 : i64} {
  func.func @_rank_loss_kernel(%arg0: i32, %arg1: memref<8x16xf32, #tpu.memory_space<vmem>>, %arg2: memref<8x1xi32, #tpu.memory_space<vmem>>, %arg3: memref<1x16xf32, #tpu.memory_space<vmem>>, %arg4: memref<1x1x1xf32, #tpu.memory_space<vmem>>) attributes {dimension_semantics = [#tpu.dimension_semantics<parallel>], iteration_bounds = array<i64: 1>, scalar_prefetch = 0 : i64, scratch_operands = 0 : i64, tpu.core_type = #tpu.core_type<tc>, window_params = [{transform_indices = @transform_0, window_bounds = array<i64: 8, 16>}, {transform_indices = @transform_1, window_bounds = array<i64: 8, 1>}, {pipeline_mode = #tpu.pipeline_mode<synchronous>, transform_indices = @transform_2, window_bounds = array<i64: 1, 16>}, {transform_indices = @transform_3, window_bounds = array<i64: 1, 1, 1>}]} {
    %c0 = arith.constant 0 : index
    %c0_0 = arith.constant 0 : index
    %0 = vector.load %arg1[%c0, %c0_0] : memref<8x16xf32, #tpu.memory_space<vmem>>, vector<8x16xf32>
    %c0_1 = arith.constant 0 : index
    %c0_2 = arith.constant 0 : index
    %1 = vector.load %arg2[%c0_1, %c0_2] : memref<8x1xi32, #tpu.memory_space<vmem>>, vector<8x1xi32>
    %2 = tpu.iota {dimensions = array<i32: 1>} : vector<8x16xi32>
    %3 = vector.broadcast %1 : vector<8x1xi32> to vector<8x16xi32>
    %4 = arith.cmpi eq, %2, %3 : vector<8x16xi32>
    %cst = arith.constant 0.000000e+00 : f32
    %5 = vector.broadcast %cst : f32 to vector<8x16xf32>
    %6 = arith.select %4, %0, %5 : vector<8x16xi1>, vector<8x16xf32>
    %cst_3 = arith.constant dense<0.000000e+00> : vector<8xf32>
    %7 = vector.multi_reduction <add>, %6, %cst_3 [1] : vector<8x16xf32> to vector<8xf32>
    %8 = vector.shape_cast %7 : vector<8xf32> to vector<8x1xf32>
    %cst_4 = arith.constant 1.000000e+00 : f32
    %9 = vector.broadcast %cst_4 : f32 to vector<8x1xf32>
    %10 = arith.subf %8, %9 : vector<8x1xf32>
    %11 = vector.broadcast %10 : vector<8x1xf32> to vector<8x16xf32>
    %12 = arith.subf %0, %11 : vector<8x16xf32>
    %cst_5 = arith.constant 0.000000e+00 : f32
    %13 = vector.broadcast %cst_5 : f32 to vector<8x16xf32>
    %14 = arith.maximumf %12, %13 : vector<8x16xf32>
    %cst_6 = arith.constant dense<0.000000e+00> : vector<8xf32>
    %15 = vector.multi_reduction <add>, %14, %cst_6 [1] : vector<8x16xf32> to vector<8xf32>
    %16 = vector.shape_cast %15 : vector<8xf32> to vector<8x1xf32>
    %cst_7 = arith.constant 1.000000e+00 : f32
    %17 = vector.broadcast %cst_7 : f32 to vector<8x1xf32>
    %18 = arith.subf %16, %17 : vector<8x1xf32>
    %19 = vector.broadcast %8 : vector<8x1xf32> to vector<8x16xf32>
    %20 = arith.cmpf ogt, %0, %19 : vector<8x16xf32>
    %21 = arith.extui %20 : vector<8x16xi1> to vector<8x16xi32>
    %22 = arith.sitofp %21 : vector<8x16xi32> to vector<8x16xf32>
    %cst_8 = arith.constant 1.000000e+00 : f32
    %23 = vector.broadcast %cst_8 : f32 to vector<16x1xf32>
    %cst_9 = arith.constant dense<0.000000e+00> : vector<8x1xf32>
    %24 = tpu.matmul %22, %23, %cst_9 {dimension_numbers = #tpu.dot_dimension_numbers<[1], [0], [0], [1], [0, 0, 1, 1], [], []>} : vector<8x16xf32>, vector<16x1xf32>, vector<8x1xf32> -> vector<8x1xf32>
    %25 = arith.fptosi %24 : vector<8x1xf32> to vector<8x1xi32>
    %26 = vector.broadcast %25 : vector<8x1xi32> to vector<8x16xi32>
    %27 = arith.cmpi eq, %2, %26 : vector<8x16xi32>
    %c0_10 = arith.constant 0 : index
    %c0_11 = arith.constant 0 : index
    %28 = vector.load %arg3[%c0_10, %c0_11] : memref<1x16xf32, #tpu.memory_space<vmem>>, vector<1x16xf32>
    %cst_12 = arith.constant 0.000000e+00 : f32
    %29 = vector.shape_cast %28 : vector<1x16xf32> to vector<1x16xf32>
    %30 = vector.broadcast %29 : vector<1x16xf32> to vector<8x16xf32>
    %31 = vector.broadcast %cst_12 : f32 to vector<8x16xf32>
    %32 = arith.select %27, %30, %31 : vector<8x16xi1>, vector<8x16xf32>
    %cst_13 = arith.constant dense<0.000000e+00> : vector<8xf32>
    %33 = vector.multi_reduction <add>, %32, %cst_13 [1] : vector<8x16xf32> to vector<8xf32>
    %34 = vector.shape_cast %33 : vector<8xf32> to vector<8x1xf32>
    %35 = arith.mulf %34, %18 : vector<8x1xf32>
    %c8_i32 = arith.constant 8 : i32
    %36 = arith.muli %arg0, %c8_i32 : i32
    %37 = tpu.iota {dimensions = array<i32: 0>} : vector<8x1xi32>
    %38 = vector.broadcast %36 : i32 to vector<8x1xi32>
    %39 = arith.addi %38, %37 : vector<8x1xi32>
    %c8_i32_14 = arith.constant 8 : i32
    %40 = vector.broadcast %c8_i32_14 : i32 to vector<8x1xi32>
    %41 = arith.cmpi slt, %39, %40 : vector<8x1xi32>
    %cst_15 = arith.constant 0.000000e+00 : f32
    %42 = vector.broadcast %cst_15 : f32 to vector<8x1xf32>
    %43 = arith.select %41, %35, %42 : vector<8x1xi1>, vector<8x1xf32>
    %cst_16 = arith.constant dense<0.000000e+00> : vector<1xf32>
    %44 = vector.multi_reduction <add>, %43, %cst_16 [0] : vector<8x1xf32> to vector<1xf32>
    %45 = vector.shape_cast %44 : vector<1xf32> to vector<1x1xf32>
    %46 = vector.shape_cast %45 : vector<1x1xf32> to vector<1x1x1xf32>
    %c0_17 = arith.constant 0 : index
    %c0_18 = arith.constant 0 : index
    %c0_19 = arith.constant 0 : index
    %47 = vector.load %arg4[%c0_17, %c0_18, %c0_19] : memref<1x1x1xf32, #tpu.memory_space<vmem>>, vector<1x1x1xf32>
    tpu.vector_store %arg4[%c0_17, %c0_18, %c0_19], %46 {strides = array<i32>} : memref<1x1x1xf32, #tpu.memory_space<vmem>>, vector<1x1x1xf32>,
    return
  }
  func.func @transform_0(%arg0: i32) -> (i32, i32) {
    %c0_i32 = arith.constant 0 : i32
    %c0_i32_0 = arith.constant 0 : i32
    return %arg0, %c0_i32 : i32, i32
  }
  func.func @transform_1(%arg0: i32) -> (i32, i32) {
    %c0_i32 = arith.constant 0 : i32
    %c0_i32_0 = arith.constant 0 : i32
    return %arg0, %c0_i32 : i32, i32
  }
  func.func @transform_2(%arg0: i32) -> (i32, i32) {
    %c0_i32 = arith.constant 0 : i32
    %c0_i32_0 = arith.constant 0 : i32
    %c0_i32_1 = arith.constant 0 : i32
    return %c0_i32, %c0_i32_0 : i32, i32
  }
  func.func @transform_3(%arg0: i32) -> (i32, i32, i32) {
    %c0_i32 = arith.constant 0 : i32
    %c0_i32_0 = arith.constant 0 : i32
    %c0_i32_1 = arith.constant 0 : i32
    return %arg0, %c0_i32, %c0_i32_0 : i32, i32, i32
  }
}

</mosaic_0001>

<bundles_post_ra>
// kernel: tpu_custom_call.1
= control target key start
LH: loop header
LB: loop body
LE: loop exit
PB: predicated region body
PF: predicated region fallthrough
CT: control target
= control target key end

     0   :  { %s188_s0 = inlined_call_operand.vmem [shape: f32[8,16], index: 0, kind: input, shape index: {}]   ;;  %s189_s1 = inlined_call_operand.vmem [shape: s32[8,1], index: 1, kind: input, shape index: {}]   ;;  %s190_s2 = inlined_call_operand.vmem [shape: f32[1,16], index: 2, kind: input, shape index: {}]   ;;  %s191_s3 = inlined_call_operand.hbm [shape: f32[1,1,1], index: 3, kind: output, shape index: {}]  }
   0x1   :  { %v16_v0 = vld [vmem:[%s189_s1] sm:$0xff] }
   0x2   :  { %8 = vsyncpa [#allocation3], 0  ;;  %v148_v1 = vmov 0   ;;  %v149_v2 = vmov 1.0   ;;  %v17_v3 = vlaneseq  ;;  %v15_v5 = vld [vmem:[%s188_s0] sm:$0xff]  ;;  %vm24_vm0 = vcmask 130048  }
   0x3   :  { %119 = vset.pattern.permute.xlu0 %v148_v1  ;;  %120 = vset.pattern.permute.xlu1 %v148_v1  ;;  %v150_v10 = vmov 0.0   ;;  %v121_v21 = vld [vmem:[%s190_s2] ss:$0 sm:$0xff]  ;;  %s151_s16 = smov [#allocation2]   ;;  %s97_s2 = sshll.u32 %s191_s3, 4  ;;  %vm88_vm5 = vcmask 0   ;;  %s98_s2 = int_to_ptr.hbm [resolvable:$true] %s97_s2 }
   0x4   :  { %20 = vperm.xlu0 %119, %v16_v0   ;;  %55 = vmatpush.msra.mxu0 %v149_v2  ;;  %v18_v4 = vand.u32 127, %v17_v3  ;;  %s95_s17 = sshll.u32 %s151_s16, 4  ;;  %s96_s17 = int_to_ptr.vmem [resolvable:$true] %s95_s17 }
   0x6   :  { %56 = vmatpush.msra.mxu0 %v149_v2 }
  0x76   :  { %v21_v6 = vpop.permute.xlu0 %20 }
  0x77   :  { %vm22_vm1 = vcmp.eq.s32.totalorder %v18_v4, %v21_v6 }
  0x78   :  { %v23_v7 = vsel %vm22_vm1, %v15_v5, 0.0 }
  0x79   :  { %v25_v8 = vsel %vm24_vm0, %v23_v7, 0.0 }
  0x7a   :  { %26 = vadd.xlane.f32.xlu0 %v25_v8 }
  0xed   :  { %v27_v9 = vpop.xlane.xlu0 %26 }
  0xee   :  { %vm35_vm2 = vcmp.gt.f32.partialorder %v15_v5, %v27_v9  ;;  %v106_v17 = vadd.f32 -1.0, %v27_v9 }
  0xef   :  { %v108_v11 = vsel %vm35_vm2, 1.0, %v150_v10 }
  0xf0   :  { %109 = vmatmul.msk.f32.vlgmr.msra.gmra.mxu0 %vm24_vm0, %v108_v11  ;;  %v29_v18 = vsub.f32 %v15_v5, %v106_v17 }
  0xf2   :  { %v30_v19 = vmax.f32 %v29_v18, 0.0 }
  0xf4   :  { %v31_v20 = vsel %vm24_vm0, %v30_v19, 0.0 }
 0x16d   :  { %v58_v12 = vpop.f32.mrf.mxu0 }
 0x16e   :  { %vm110_vm3 = vcmp.lt.s32.totalorder %v58_v12, 0  ;;  %v111_v13 = vceil.f32 %v58_v12  ;;  %v112_v14 = vfloor.f32 %v58_v12 }
 0x170   :  { %v113_v15 = vsel %vm110_vm3, %v111_v13, %v112_v14 }
 0x171   :  { %v114_v16 = vcvt.f32.s32 %v113_v15 }
 0x173   :  { %63 = vperm.xlu1 %120, %v114_v16  }
 0x19d   :  { %32 = vadd.xlane.f32.xlu1 %v31_v20 }
 0x1e5   :  { %v64_v22 = vpop.permute.xlu1 %63 }
 0x1e6   :  { %vm65_vm4 = vcmp.eq.s32.totalorder %v18_v4, %v64_v22 }
 0x1e7   :  { %v70_v23 = vsel %vm65_vm4, %v121_v21, 0.0 }
 0x1e8   :  { %v71_v24 = vsel %vm24_vm0, %v70_v23, 0.0 }
 0x1e9   :  { %72 = vadd.xlane.f32.xlu2 %v71_v24 }
 0x210   :  { %v33_v25 = vpop.xlane.xlu1 %32 }
 0x211   :  { %v107_v26 = vadd.f32 -1.0, %v33_v25 }
 0x25c   :  { %v73_v27 = vpop.xlane.xlu2 %72 }
 0x25d   :  { %v74_v28 = vmul.f32 %v107_v26, %v73_v27 }
 0x25f   :  { %v82_v29 = vrot.slane %v74_v28, 4 }
 0x261   :  { %v83_v30 = vadd.f32 %v82_v29, %v74_v28 }
 0x263   :  { %v84_v31 = vrot.slane %v83_v30, 2 }
 0x265   :  { %v85_v32 = vadd.f32 %v84_v31, %v83_v30 }
 0x267   :  { %v86_v33 = vrot.slane %v85_v32, 1 }
 0x269   :  { %v87_v34 = vadd.f32 %v86_v33, %v85_v32 }
 0x26b   :  { %89 = vst.msk [vmem:[#allocation2] sm:$0x1] %vm88_vm5, %v87_v34 }
 0x26c   :  { %100 = dma.vmem_to_hbm [thread:$0]  %s96_s17, 16, %s98_s2, [#allocation3]  }
 0x26d   :  { %146 = dma.done.wait [#allocation3], 16  }
 0x26e   :  { %147 = vsyncadd [#allocation3], 4294967280 }
 0x26f   :  { %105 = vsyncpa [#allocation3], 1 }

</bundles_post_ra>
